<compile_context>
chip_gen: v5e
topology: v5e:2x2
jax: 0.10.0
libtpu: 0.0.40
codegen_flags: <defaults>
</compile_context>

<pallas_src>
import functools

import jax
import jax.numpy as jnp
from jax.experimental import pallas as pl
from jax.experimental.pallas import tpu as pltpu


def _round_up(x: int, m: int) -> int:
    return ((x + m - 1) // m) * m


def _mlp_kernel(x_ref, w1_ref, b1_ref, w2_ref, b2_ref, o_ref):
    # x : (TB, in_dim)      w1: (in_dim, hidden)   b1: (1, hidden)
    # w2: (hidden, out2)    b2: (1, out2)          o : (TB, out2)
    x = x_ref[...]
    h = jnp.dot(x, w1_ref[...], preferred_element_type=jnp.float32) + b1_ref[...]
    h = jnp.maximum(h, 0.0)                                   # ReLU (f32, VPU)
    y = jnp.dot(h.astype(w2_ref.dtype), w2_ref[...],
                preferred_element_type=jnp.float32) + b2_ref[...]
    y = jnp.tanh(jnp.maximum(y, 0.0))                         # ReLU -> Tanh (f32, EUP)
    o_ref[...] = y.astype(o_ref.dtype)


def mlp_location_forward_batch(features_batch, params, users_num, output_num,
                               compute_dtype=jnp.float32, tb_cap=1024):
    """Batched MLP.forward: (B, num_rows, 2) -> (B, output_num, 2).

    One pallas_call for the whole batch; batch rows fill the MXU M dimension,
    weights/biases stay VMEM-resident across grid steps.
    """
    w1, b1, w2, b2 = params["w1"], params["b1"], params["w2"], params["b2"]
    B = features_batch.shape[0]
    in_dim = 2 * users_num * 2
    hidden = w1.shape[1]
    out2 = output_num * 2

    # Glue: slice the first 2*users_num user rows per element and flatten.
    # XLA materializes this (B, in_dim) copy before the pallas_call.
    # TODO(synk): evaluate CompilerParams(allow_input_fusion=...) to fuse it
    # into the kernel's activation operand and save one activation pass.
    users_cat = features_batch[:, : 2 * users_num, :].reshape(B, in_dim)

    x_in = users_cat.astype(compute_dtype)
    w1_in = w1.astype(compute_dtype)
    w2_in = w2.astype(compute_dtype)

    # ---- batch tiling -----------------------------------------------------
    # Per-step fixed cost (~0.35 us) dominates this tiny MLP, so use large
    # batch tiles (up to tb_cap rows).  Derive TB from cdiv(B, n_steps) so we
    # never blow up B_pad, and force >=2 grid steps (when B is large enough)
    # so the "parallel" axis can shard across v7x's two TensorCores.
    row_align = 16 if jnp.dtype(compute_dtype) == jnp.dtype(jnp.bfloat16) else 8
    n_steps = max(1, pl.cdiv(B, tb_cap))
    if n_steps == 1 and B >= 4 * row_align:
        n_steps = 2
    TB = min(tb_cap, _round_up(pl.cdiv(B, n_steps), row_align))
    grid_b = pl.cdiv(B, TB)
    B_pad = grid_b * TB
    if B_pad != B:
        x_in = jnp.pad(x_in, ((0, B_pad - B), (0, 0)))

    itemsize = jnp.dtype(compute_dtype).itemsize
    cost = pl.CostEstimate(
        flops=2 * B_pad * (in_dim * hidden + hidden * out2),
        transcendentals=B_pad * out2,
        bytes_accessed=(B_pad * in_dim * itemsize                 # x read
                        + B_pad * out2 * 4                        # out write (f32)
                        + (in_dim * hidden + hidden * out2) * itemsize  # weights
                        + (hidden + out2) * 4),                   # biases (f32)
    )

    out = pl.pallas_call(
        _mlp_kernel,
        out_shape=jax.ShapeDtypeStruct((B_pad, out2), jnp.float32),
        grid_spec=pltpu.PrefetchScalarGridSpec(
            num_scalar_prefetch=0,
            grid=(grid_b,),
            in_specs=[
                pl.BlockSpec((TB, in_dim), lambda i: (i, 0)),       # activations
                pl.BlockSpec((in_dim, hidden), lambda i: (0, 0)),   # w1 (resident)
                pl.BlockSpec((1, hidden), lambda i: (0, 0)),        # b1
                pl.BlockSpec((hidden, out2), lambda i: (0, 0)),     # w2 (resident)
                pl.BlockSpec((1, out2), lambda i: (0, 0)),          # b2
            ],
            out_specs=pl.BlockSpec((TB, out2), lambda i: (i, 0)),
        ),
        compiler_params=pltpu.CompilerParams(
            dimension_semantics=("parallel",)),   # megacore on v7x; no-op v5e/v6e
        cost_estimate=cost,
    )(x_in, w1_in, b1, w2_in, b2)

    # Glue: drop batch padding, reshape (B, out2) -> (B, output_num, 2).
    return out[:B].reshape(B, output_num, 2)


def mlp_location_forward(features, params, users_num, output_num):
    """Module-faithful single-sample forward: (num_rows, 2) -> (output_num, 2)."""
    return mlp_location_forward_batch(features[None], params,
                                      users_num, output_num)[0]


def init_params(key, users_num, hidden_dim, output_num):
    """Deterministic parameter init (PyTorch Linear-style uniform bounds)."""
    in_dim = 2 * users_num * 2
    out2 = output_num * 2
    k1, k2, k3, k4 = jax.random.split(key, 4)
    bound1 = 1.0 / jnp.sqrt(in_dim)
    bound2 = 1.0 / jnp.sqrt(hidden_dim)
    return {
        "w1": jax.random.uniform(k1, (in_dim, hidden_dim), jnp.float32,
                                 -bound1, bound1),
        "b1": jax.random.uniform(k2, (1, hidden_dim), jnp.float32,
                                 -bound1, bound1),
        "w2": jax.random.uniform(k3, (hidden_dim, out2), jnp.float32,
                                 -bound2, bound2),
        "b2": jax.random.uniform(k4, (1, out2), jnp.float32,
                                 -bound2, bound2),
    }


def _reference(users_cat, params):
    h = jnp.maximum(users_cat @ params["w1"] + params["b1"], 0.0)
    return jnp.tanh(jnp.maximum(h @ params["w2"] + params["b2"], 0.0))


if __name__ == "__main__":
    # Small, module-consistent shapes.
    users_num = 8       # -> location_mlp input dim = 2*8*2 = 32
    hidden_dim = 32
    output_num = 4      # -> per-sample output (4, 2)
    batch = 16          # single-step grid
    batch2 = 40         # multi-step grid (>=2 parallel steps, padded batch)
    num_rows = 2 * users_num + 4

    key = jax.random.PRNGKey(0)
    kf, kp, kf2 = jax.random.split(key, 3)

    features_batch = jax.random.normal(kf, (batch, num_rows, 2), jnp.float32)
    features_batch2 = jax.random.normal(kf2, (batch2, num_rows, 2), jnp.float32)
    params = init_params(kp, users_num, hidden_dim, output_num)

    fwd_batch = jax.jit(functools.partial(mlp_location_forward_batch,
                                          users_num=users_num,
                                          output_num=output_num))

    # Batched path, single grid step.
    uav_batch = jax.block_until_ready(fwd_batch(features_batch, params))
    assert uav_batch.shape == (batch, output_num, 2)

    # Single-sample path (exactly the PyTorch module's forward()).
    uav_single = jax.block_until_ready(
        mlp_location_forward(features_batch[0], params, users_num, output_num))
    assert uav_single.shape == (output_num, 2)

    # Batched path, multi-step parallel grid + batch padding.
    uav_batch2 = jax.block_until_ready(fwd_batch(features_batch2, params))
    assert uav_batch2.shape == (batch2, output_num, 2)

    # Pure-JAX reference checks (f32 path: tight tolerance).
    users_cat = features_batch[:, : 2 * users_num, :].reshape(batch, -1)
    ref = _reference(users_cat, params).reshape(batch, output_num, 2)
    users_cat2 = features_batch2[:, : 2 * users_num, :].reshape(batch2, -1)
    ref2 = _reference(users_cat2, params).reshape(batch2, output_num, 2)
    assert jnp.allclose(uav_batch, ref, atol=1e-5, rtol=1e-5)
    assert jnp.allclose(uav_single, ref[0], atol=1e-5, rtol=1e-5)
    assert jnp.allclose(uav_batch2, ref2, atol=1e-5, rtol=1e-5)

    # Optional bf16 matmul-input path (v6e/v7x lever; f32 accum + epilogue).
    fwd_bf16 = jax.jit(functools.partial(mlp_location_forward_batch,
                                         users_num=users_num,
                                         output_num=output_num,
                                         compute_dtype=jnp.bfloat16))
    uav_bf16 = jax.block_until_ready(fwd_bf16(features_batch2, params))
    assert jnp.allclose(uav_bf16, ref2, atol=5e-2, rtol=5e-2)

    print("KERNEL_OK")
</pallas_src>

<mosaic_0001>
module attributes {stable_mosaic.version = 11 : i64} {
  func.func @_mlp_kernel(%arg0: i32, %arg1: memref<16x32xf32, #tpu.memory_space<vmem>>, %arg2: memref<32x32xf32, #tpu.memory_space<vmem>>, %arg3: memref<1x32xf32, #tpu.memory_space<vmem>>, %arg4: memref<32x8xf32, #tpu.memory_space<vmem>>, %arg5: memref<1x8xf32, #tpu.memory_space<vmem>>, %arg6: memref<16x8xf32, #tpu.memory_space<vmem>>) attributes {dimension_semantics = [#tpu.dimension_semantics<parallel>], iteration_bounds = array<i64: 1>, scalar_prefetch = 0 : i64, scratch_operands = 0 : i64, tpu.core_type = #tpu.core_type<tc>, window_params = [{transform_indices = @transform_0, window_bounds = array<i64: 16, 32>}, {pipeline_mode = #tpu.pipeline_mode<synchronous>, transform_indices = @transform_1, window_bounds = array<i64: 32, 32>}, {pipeline_mode = #tpu.pipeline_mode<synchronous>, transform_indices = @transform_2, window_bounds = array<i64: 1, 32>}, {pipeline_mode = #tpu.pipeline_mode<synchronous>, transform_indices = @transform_3, window_bounds = array<i64: 32, 8>}, {pipeline_mode = #tpu.pipeline_mode<synchronous>, transform_indices = @transform_4, window_bounds = array<i64: 1, 8>}, {transform_indices = @transform_5, window_bounds = array<i64: 16, 8>}]} {
    %c0 = arith.constant 0 : index
    %c0_0 = arith.constant 0 : index
    %0 = vector.load %arg1[%c0, %c0_0] : memref<16x32xf32, #tpu.memory_space<vmem>>, vector<16x32xf32>
    %c0_1 = arith.constant 0 : index
    %c0_2 = arith.constant 0 : index
    %1 = vector.load %arg2[%c0_1, %c0_2] : memref<32x32xf32, #tpu.memory_space<vmem>>, vector<32x32xf32>
    %cst = arith.constant dense<0.000000e+00> : vector<16x32xf32>
    %2 = tpu.matmul %0, %1, %cst {dimension_numbers = #tpu.dot_dimension_numbers<[1], [0], [0], [1], [0, 0, 1, 1], [], []>} : vector<16x32xf32>, vector<32x32xf32>, vector<16x32xf32> -> vector<16x32xf32>
    %c0_3 = arith.constant 0 : index
    %c0_4 = arith.constant 0 : index
    %3 = vector.load %arg3[%c0_3, %c0_4] : memref<1x32xf32, #tpu.memory_space<vmem>>, vector<1x32xf32>
    %4 = vector.broadcast %3 : vector<1x32xf32> to vector<16x32xf32>
    %5 = arith.addf %2, %4 : vector<16x32xf32>
    %cst_5 = arith.constant 0.000000e+00 : f32
    %6 = vector.broadcast %cst_5 : f32 to vector<16x32xf32>
    %7 = arith.maximumf %5, %6 : vector<16x32xf32>
    %c0_6 = arith.constant 0 : index
    %c0_7 = arith.constant 0 : index
    %8 = vector.load %arg4[%c0_6, %c0_7] : memref<32x8xf32, #tpu.memory_space<vmem>>, vector<32x8xf32>
    %cst_8 = arith.constant dense<0.000000e+00> : vector<16x8xf32>
    %9 = tpu.matmul %7, %8, %cst_8 {dimension_numbers = #tpu.dot_dimension_numbers<[1], [0], [0], [1], [0, 0, 1, 1], [], []>} : vector<16x32xf32>, vector<32x8xf32>, vector<16x8xf32> -> vector<16x8xf32>
    %c0_9 = arith.constant 0 : index
    %c0_10 = arith.constant 0 : index
    %10 = vector.load %arg5[%c0_9, %c0_10] : memref<1x8xf32, #tpu.memory_space<vmem>>, vector<1x8xf32>
    %11 = vector.broadcast %10 : vector<1x8xf32> to vector<16x8xf32>
    %12 = arith.addf %9, %11 : vector<16x8xf32>
    %cst_11 = arith.constant 0.000000e+00 : f32
    %13 = vector.broadcast %cst_11 : f32 to vector<16x8xf32>
    %14 = arith.maximumf %12, %13 : vector<16x8xf32>
    %15 = math.tanh %14 : vector<16x8xf32>
    %c0_12 = arith.constant 0 : index
    %c0_13 = arith.constant 0 : index
    %16 = vector.load %arg6[%c0_12, %c0_13] : memref<16x8xf32, #tpu.memory_space<vmem>>, vector<16x8xf32>
    tpu.vector_store %arg6[%c0_12, %c0_13], %15 {strides = array<i32>} : memref<16x8xf32, #tpu.memory_space<vmem>>, vector<16x8xf32>,
    return
  }
  func.func @transform_0(%arg0: i32) -> (i32, i32) {
    %c0_i32 = arith.constant 0 : i32
    %c0_i32_0 = arith.constant 0 : i32
    return %arg0, %c0_i32 : i32, i32
  }
  func.func @transform_1(%arg0: i32) -> (i32, i32) {
    %c0_i32 = arith.constant 0 : i32
    %c0_i32_0 = arith.constant 0 : i32
    %c0_i32_1 = arith.constant 0 : i32
    return %c0_i32, %c0_i32_0 : i32, i32
  }
  func.func @transform_2(%arg0: i32) -> (i32, i32) {
    %c0_i32 = arith.constant 0 : i32
    %c0_i32_0 = arith.constant 0 : i32
    %c0_i32_1 = arith.constant 0 : i32
    return %c0_i32, %c0_i32_0 : i32, i32
  }
  func.func @transform_3(%arg0: i32) -> (i32, i32) {
    %c0_i32 = arith.constant 0 : i32
    %c0_i32_0 = arith.constant 0 : i32
    %c0_i32_1 = arith.constant 0 : i32
    return %c0_i32, %c0_i32_0 : i32, i32
  }
  func.func @transform_4(%arg0: i32) -> (i32, i32) {
    %c0_i32 = arith.constant 0 : i32
    %c0_i32_0 = arith.constant 0 : i32
    %c0_i32_1 = arith.constant 0 : i32
    return %c0_i32, %c0_i32_0 : i32, i32
  }
  func.func @transform_5(%arg0: i32) -> (i32, i32) {
    %c0_i32 = arith.constant 0 : i32
    %c0_i32_0 = arith.constant 0 : i32
    return %arg0, %c0_i32 : i32, i32
  }
}

</mosaic_0001>

<bundles_post_ra>
// kernel: mlp_location_forward_batch.1
= control target key start
LH: loop header
LB: loop body
LE: loop exit
PB: predicated region body
PF: predicated region fallthrough
CT: control target
= control target key end

     0   :  { %vm30_vm0 = vcmask 261120   ;;  %vm103_vm1 = vcmask 64512   ;;  %s204_s1 = inlined_call_operand.vmem [shape: f32[32,32], index: 1, kind: input, shape index: {}]   ;;  %s205_s3 = inlined_call_operand.vmem [shape: f32[32,8], index: 3, kind: input, shape index: {}]   ;;  %s206_s2 = inlined_call_operand.vmem [shape: f32[1,32], index: 2, kind: input, shape index: {}]   ;;  %s207_s0 = inlined_call_operand.vmem [shape: f32[16,32], index: 0, kind: input, shape index: {}]   ;;  %s208_s4 = inlined_call_operand.vmem [shape: f32[1,8], index: 4, kind: input, shape index: {}]   ;;  %s209_s5 = inlined_call_operand.vmem [shape: f32[16,8], index: 5, kind: output, shape index: {}]  }
   0x1   :  { %v25_v0 = vld [vmem:[%s204_s1 + $0x18] sm:$0xff]  ;;  %v24_v1 = vld [vmem:[%s204_s1 + $0x10] sm:$0xff]  ;;  %v23_v2 = vld [vmem:[%s204_s1 + $0x8] sm:$0xff] }
   0x2   :  { %114 = vmatpush.msra.mxu2 %v25_v0  ;;  %49 = vmatpush.msra.mxu0 %v25_v0  ;;  %v65_v3 = vld [vmem:[%s205_s3 + $0x18] sm:$0xff]  ;;  %v22_v4 = vld [vmem:[%s204_s1] sm:$0xff]  ;;  %v21_v5 = vld [vmem:[%s207_s0 + $0x8] sm:$0xff] }
   0x3   :  { %118 = vmatpush.msra.mxu3 %v65_v3  ;;  %88 = vmatpush.msra.mxu1 %v65_v3  ;;  %v20_v6 = vld [vmem:[%s207_s0] sm:$0xff]  ;;  %v64_v7 = vld [vmem:[%s205_s3 + $0x10] sm:$0xff]  ;;  %v63_v8 = vld [vmem:[%s205_s3 + $0x8] sm:$0xff] }
   0x4   :  { %115 = vmatpush.msra.mxu2 %v24_v1  ;;  %50 = vmatpush.msra.mxu0 %v24_v1  ;;  %v62_v9 = vld [vmem:[%s205_s3] sm:$0xff] }
   0x5   :  { %119 = vmatpush.msra.mxu3 %v64_v7  ;;  %89 = vmatpush.msra.mxu1 %v64_v7  ;;  %v122_v10 = vld [vmem:[%s206_s2] ss:$0 sm:$0xff] }
   0x6   :  { %116 = vmatpush.msra.mxu2 %v23_v2  ;;  %51 = vmatpush.msra.mxu0 %v23_v2  ;;  %v123_v17 = vld [vmem:[%s208_s4] ss:$0 sm:$0xff] }
   0x7   :  { %120 = vmatpush.msra.mxu3 %v63_v8  ;;  %90 = vmatpush.msra.mxu1 %v63_v8 }
   0x8   :  { %117 = vmatpush.msra.mxu2 %v22_v4  ;;  %52 = vmatpush.msra.mxu0 %v22_v4 }
   0x9   :  { %111 = vmatmul.msk.f32.vlgmr.msra.gmra.mxu2 %vm30_vm0, %v21_v5  ;;  %110 = vmatmul.msk.f32.vlgmr.msra.gmra.mxu0 %vm30_vm0, %v20_v6 }
   0xa   :  { %121 = vmatpush.msra.mxu3 %v62_v9  ;;  %91 = vmatpush.msra.mxu1 %v62_v9 }
  0x86   :  { %v54_v11 = vpop.f32.mrf.mxu0 }
  0x87   :  { %v55_v12 = vadd.f32 %v122_v10, %v54_v11 }
  0x89   :  { %v60_v13 = vmax.f32 %v55_v12, 0.0 }
  0x8b   :  { %112 = vmatmul.msk.f32.vlgmr.msra.gmra.mxu1 %vm30_vm0, %v60_v13 }
  0x8c   :  { %v57_v14 = vpop.f32.mrf.mxu2 }
  0x8d   :  { %v58_v15 = vadd.f32 %v122_v10, %v57_v14 }
  0x8f   :  { %v61_v16 = vmax.f32 %v58_v15, 0.0 }
  0x91   :  { %113 = vmatmul.msk.f32.vlgmr.msra.gmra.mxu3 %vm30_vm0, %v61_v16 }
 0x108   :  { %v93_v18 = vpop.f32.mrf.mxu1 }
 0x109   :  { %v94_v19 = vadd.f32 %v123_v17, %v93_v18 }
 0x10b   :  { %v99_v20 = vmax.f32 %v94_v19, 0.0 }
 0x10d   :  { %124 = vtanh.f32 %v99_v20 }
 0x113   :  { %v125_v21 = vpop.eup %124 }
 0x114   :  { %104 = vst.msk [vmem:[%s209_s5] sm:$0xff] %vm103_vm1, %v125_v21  ;;  %v96_v22 = vpop.f32.mrf.mxu3 }
 0x115   :  { %v97_v23 = vadd.f32 %v123_v17, %v96_v22 }
 0x117   :  { %v100_v24 = vmax.f32 %v97_v23, 0.0 }
 0x119   :  { %126 = vtanh.f32 %v100_v24 }
 0x11f   :  { %v127_v25 = vpop.eup %126 }
 0x120   :  { %105 = vst.msk [vmem:[%s209_s5 + $0x8] sm:$0xff] %vm103_vm1, %v127_v25 }

</bundles_post_ra>
